<compile_context>
chip_gen: v7x
topology: tpu7x:2x2x1
jax: 0.10.0
libtpu: 0.0.40
codegen_flags: <defaults>
</compile_context>

<pallas_src>
import math
from functools import partial

import jax
import jax.numpy as jnp
from jax.experimental import pallas as pl
from jax.experimental.pallas import tpu as pltpu


def covnet_shallow_kernel(u_ref, w1_ref, b1_ref, w2_ref, o_ref, *, matmul_dtype):
    # u: (TB, d)   w1: (R, d)   b1: (1, R)   w2: (N, R)   out: (N, TB)
    u = u_ref[...].astype(matmul_dtype)
    w1 = w1_ref[...].astype(matmul_dtype)
    w2 = w2_ref[...].astype(matmul_dtype)
    b1 = b1_ref[...]  # f32

    dn = (((1,), (1,)), ((), ()))  # contract last dim with last dim

    # first_step: sigmoid(u @ W1^T + b1) -> (TB, R); no materialized transpose.
    h = jax.lax.dot_general(u, w1, dn, preferred_element_type=jnp.float32)
    h = jax.nn.sigmoid(h + b1)  # bias add + sigmoid stay in f32

    # final_layer + forward's .T fused: w2 (N,R) x h (TB,R) -> (N, TB).
    y = jax.lax.dot_general(w2, h.astype(matmul_dtype), dn,
                            preferred_element_type=jnp.float32)
    o_ref[...] = y.astype(o_ref.dtype)


def covnet_shallow_forward(u, w1, b1, w2, *,
                           matmul_dtype=jnp.bfloat16, block_b=512):
    """forward(u) of CovNetShallow: (N, B) = (sigmoid(u @ W1^T + b1) @ W2^T)^T."""
    B, d = u.shape
    R, d2 = w1.shape
    N, R2 = w2.shape
    assert d == d2 and R == R2 and b1.shape == (R,)
    b1_2d = b1.reshape(1, R).astype(jnp.float32)

    # Batch tiling: stream (TB, d) activation tiles while weights stay resident.
    # TB is a multiple of 128 whenever we actually tile, so the (N, TB) output
    # block is lane-dense.  Small B falls back to one full-array block (legal
    # since block dims then equal the full array dims).
    if B > block_b:
        TB = block_b
        B_pad = pl.cdiv(B, TB) * TB
        if B_pad != B:
            u = jnp.pad(u, ((0, B_pad - B), (0, 0)))
    else:
        TB = B
        B_pad = B
    grid = (B_pad // TB,)

    flops = 2 * B_pad * d * R + 2 * B_pad * R * N
    bytes_accessed = 4 * (B_pad * d + R * d + R + N * R + N * B_pad)

    out = pl.pallas_call(
        partial(covnet_shallow_kernel, matmul_dtype=matmul_dtype),
        out_shape=jax.ShapeDtypeStruct((N, B_pad), jnp.float32),
        grid=grid,
        in_specs=[
            pl.BlockSpec((TB, d), lambda i: (i, 0)),   # streamed activations
            pl.BlockSpec((R, d), lambda i: (0, 0)),    # resident weights
            pl.BlockSpec((1, R), lambda i: (0, 0)),    # resident bias
            pl.BlockSpec((N, R), lambda i: (0, 0)),    # resident weights
        ],
        out_specs=pl.BlockSpec((N, TB), lambda i: (0, i)),
        compiler_params=pltpu.CompilerParams(
            # batch axis is embarrassingly parallel -> shards over v7x's 2 TCs
            dimension_semantics=("parallel",),
            # conservative budget that fits v7x's 64 MiB physical VMEM
            vmem_limit_bytes=32 * 1024 * 1024,
        ),
        cost_estimate=pl.CostEstimate(
            flops=flops,
            transcendentals=B_pad * R,
            bytes_accessed=bytes_accessed,
        ),
    )(u, w1, b1_2d, w2)

    return out[:, :B]


def covnet_shallow_reference(u, w1, b1, w2, matmul_dtype=jnp.float32):
    """Plain-JAX forward using the same dtype strategy as the kernel."""
    dn = (((1,), (1,)), ((), ()))
    h = jax.lax.dot_general(u.astype(matmul_dtype), w1.astype(matmul_dtype), dn,
                            preferred_element_type=jnp.float32)
    h = jax.nn.sigmoid(h + b1.reshape(1, -1))
    y = jax.lax.dot_general(w2.astype(matmul_dtype), h.astype(matmul_dtype), dn,
                            preferred_element_type=jnp.float32)
    return y


def xavier_normal(key, out_features, in_features):
    # torch.nn.init.xavier_normal_: std = gain * sqrt(2 / (fan_in + fan_out)), gain=1
    std = math.sqrt(2.0 / (in_features + out_features))
    return std * jax.random.normal(key, (out_features, in_features), dtype=jnp.float32)


if __name__ == "__main__":
    d, R, N = 16, 32, 8
    key = jax.random.PRNGKey(0)
    k_u, k_w1, k_w2, k_u2 = jax.random.split(key, 4)

    w1 = xavier_normal(k_w1, R, d)            # first_layer.weight (R, d)
    b1 = jnp.zeros((R,), dtype=jnp.float32)   # first_layer.bias zero-init
    w2 = xavier_normal(k_w2, N, R)            # final_layer.weight (N, R), no bias

    # --- small batch, pure-f32 path: strict check of forward semantics ---
    B = 8
    u = jax.random.normal(k_u, (B, d), dtype=jnp.float32)
    out_f32 = jax.block_until_ready(
        covnet_shallow_forward(u, w1, b1, w2, matmul_dtype=jnp.float32))
    ref_f32 = (jax.nn.sigmoid(u @ w1.T + b1) @ w2.T).T
    assert out_f32.shape == (N, B)
    assert jnp.allclose(out_f32, ref_f32, atol=1e-5, rtol=1e-5)

    # --- small batch, default bf16-MXU path (f32 accumulation) ---
    out_bf16 = jax.block_until_ready(covnet_shallow_forward(u, w1, b1, w2))
    ref_bf16 = covnet_shallow_reference(u, w1, b1, w2, jnp.bfloat16)
    assert out_bf16.shape == (N, B)
    assert jnp.allclose(out_bf16, ref_bf16, atol=1e-2, rtol=1e-2)

    # --- larger, non-multiple batch exercises the tiled + padded + lane-dense path ---
    B2 = 640
    u2 = jax.random.normal(k_u2, (B2, d), dtype=jnp.float32)
    out2 = jax.block_until_ready(
        covnet_shallow_forward(u2, w1, b1, w2, block_b=512))
    ref2 = covnet_shallow_reference(u2, w1, b1, w2, jnp.bfloat16)
    assert out2.shape == (N, B2)
    assert jnp.allclose(out2, ref2, atol=1e-2, rtol=1e-2)

    print("KERNEL_OK")
</pallas_src>

<mosaic_0001>
module attributes {stable_mosaic.version = 11 : i64} {
  func.func @covnet_shallow_kernel(%arg0: i32, %arg1: memref<8x16xf32, #tpu.memory_space<vmem>>, %arg2: memref<32x16xf32, #tpu.memory_space<vmem>>, %arg3: memref<1x32xf32, #tpu.memory_space<vmem>>, %arg4: memref<8x32xf32, #tpu.memory_space<vmem>>, %arg5: memref<8x8xf32, #tpu.memory_space<vmem>>) attributes {dimension_semantics = [#tpu.dimension_semantics<parallel>], iteration_bounds = array<i64: 1>, scalar_prefetch = 0 : i64, scratch_operands = 0 : i64, tpu.core_type = #tpu.core_type<tc>, window_params = [{transform_indices = @transform_0, window_bounds = array<i64: 8, 16>}, {pipeline_mode = #tpu.pipeline_mode<synchronous>, transform_indices = @transform_1, window_bounds = array<i64: 32, 16>}, {pipeline_mode = #tpu.pipeline_mode<synchronous>, transform_indices = @transform_2, window_bounds = array<i64: 1, 32>}, {pipeline_mode = #tpu.pipeline_mode<synchronous>, transform_indices = @transform_3, window_bounds = array<i64: 8, 32>}, {transform_indices = @transform_4, window_bounds = array<i64: 8, 8>}]} {
    %c0 = arith.constant 0 : index
    %c0_0 = arith.constant 0 : index
    %0 = vector.load %arg1[%c0, %c0_0] : memref<8x16xf32, #tpu.memory_space<vmem>>, vector<8x16xf32>
    %c0_1 = arith.constant 0 : index
    %c0_2 = arith.constant 0 : index
    %1 = vector.load %arg2[%c0_1, %c0_2] : memref<32x16xf32, #tpu.memory_space<vmem>>, vector<32x16xf32>
    %c0_3 = arith.constant 0 : index
    %c0_4 = arith.constant 0 : index
    %2 = vector.load %arg4[%c0_3, %c0_4] : memref<8x32xf32, #tpu.memory_space<vmem>>, vector<8x32xf32>
    %c0_5 = arith.constant 0 : index
    %c0_6 = arith.constant 0 : index
    %3 = vector.load %arg3[%c0_5, %c0_6] : memref<1x32xf32, #tpu.memory_space<vmem>>, vector<1x32xf32>
    %cst = arith.constant dense<0.000000e+00> : vector<8x32xf32>
    %4 = tpu.matmul %0, %1, %cst {dimension_numbers = #tpu.dot_dimension_numbers<[1], [1], [0], [0], [0, 0, 1, 0], [], []>} : vector<8x16xf32>, vector<32x16xf32>, vector<8x32xf32> -> vector<8x32xf32>
    %5 = vector.broadcast %3 : vector<1x32xf32> to vector<8x32xf32>
    %6 = arith.addf %4, %5 : vector<8x32xf32>
    %7 = arith.negf %6 : vector<8x32xf32>
    %8 = math.exp %7 : vector<8x32xf32>
    %cst_7 = arith.constant 1.000000e+00 : f32
    %9 = vector.broadcast %cst_7 : f32 to vector<8x32xf32>
    %10 = arith.addf %9, %8 : vector<8x32xf32>
    %11 = arith.divf %9, %10 : vector<8x32xf32>
    %cst_8 = arith.constant dense<0.000000e+00> : vector<8x8xf32>
    %12 = tpu.matmul %2, %11, %cst_8 {dimension_numbers = #tpu.dot_dimension_numbers<[1], [1], [0], [0], [0, 0, 1, 0], [], []>} : vector<8x32xf32>, vector<8x32xf32>, vector<8x8xf32> -> vector<8x8xf32>
    %c0_9 = arith.constant 0 : index
    %c0_10 = arith.constant 0 : index
    %13 = vector.load %arg5[%c0_9, %c0_10] : memref<8x8xf32, #tpu.memory_space<vmem>>, vector<8x8xf32>
    tpu.vector_store %arg5[%c0_9, %c0_10], %12 {strides = array<i32>} : memref<8x8xf32, #tpu.memory_space<vmem>>, vector<8x8xf32>,
    return
  }
  func.func @transform_0(%arg0: i32) -> (i32, i32) {
    %c0_i32 = arith.constant 0 : i32
    %c0_i32_0 = arith.constant 0 : i32
    return %arg0, %c0_i32 : i32, i32
  }
  func.func @transform_1(%arg0: i32) -> (i32, i32) {
    %c0_i32 = arith.constant 0 : i32
    %c0_i32_0 = arith.constant 0 : i32
    %c0_i32_1 = arith.constant 0 : i32
    return %c0_i32, %c0_i32_0 : i32, i32
  }
  func.func @transform_2(%arg0: i32) -> (i32, i32) {
    %c0_i32 = arith.constant 0 : i32
    %c0_i32_0 = arith.constant 0 : i32
    %c0_i32_1 = arith.constant 0 : i32
    return %c0_i32, %c0_i32_0 : i32, i32
  }
  func.func @transform_3(%arg0: i32) -> (i32, i32) {
    %c0_i32 = arith.constant 0 : i32
    %c0_i32_0 = arith.constant 0 : i32
    %c0_i32_1 = arith.constant 0 : i32
    return %c0_i32, %c0_i32_0 : i32, i32
  }
  func.func @transform_4(%arg0: i32) -> (i32, i32) {
    %c0_i32 = arith.constant 0 : i32
    %c0_i32_0 = arith.constant 0 : i32
    return %c0_i32, %arg0 : i32, i32
  }
}

</mosaic_0001>

<bundles_post_ra>
// kernel: tpu_custom_call.1
= control target key start
LH: loop header
LB: loop body
LE: loop exit
PB: predicated region body
PF: predicated region fallthrough
CT: control target
= control target key end

     0   :  { %vm31_vm0 = vcmask 130048   ;;  %v288_v2 = vmov 0.0|0.0   ;;  %vm289_vm2 = vmmov 0   ;;  %v290_v4 = vmov 0.0   ;;  %s353_s0 = inlined_call_operand.vmem [shape: f32[8,16], index: 0, kind: input, shape index: {}]   ;;  %s354_s1 = inlined_call_operand.vmem [shape: f32[32,16], index: 1, kind: input, shape index: {}]   ;;  %s355_s2 = inlined_call_operand.vmem [shape: f32[1,32], index: 2, kind: input, shape index: {}]   ;;  %s356_s3 = inlined_call_operand.vmem [shape: f32[8,32], index: 3, kind: input, shape index: {}]   ;;  %s357_s4 = inlined_call_operand.hbm [shape: f32[8,8], index: 4, kind: output, shape index: {}]  }
   0x1   :  { %v19_v0 = vld [vmem:[%s354_s1] sm:$0xff]  ;;  %v20_v1 = vld [vmem:[%s354_s1 + $0x8] sm:$0xff]  ;;  %248 = vmatprep.subr.bf16.mxu0 %v288_v2  ;;  %vm250_vm1 = vmpackc.low %vm31_vm0, %vm31_vm0  ;;  %240 = vmatprep.mubr.msk.f32.mxu0 %vm289_vm2, %v290_v4 }
   0x2   :  { %v249_v3 = vpack.c.bf16 %v20_v1, %v19_v0  ;;  %243 = vmatprep.subr.mxu1 %v290_v4 }
   0x3   :  { %9 = vsyncpa [#allocation3], 0  ;;  %245 = vmatprep.mubr.msk.f32.mxu1 %vm289_vm2, %v290_v4  ;;  %v21_v5 = vld [vmem:[%s354_s1 + $0x10] sm:$0xff]  ;;  %v22_v6 = vld [vmem:[%s354_s1 + $0x18] sm:$0xff]  ;;  %vm123_vm3 = vcmask 261120   ;;  %vm200_vm4 = vcmask 64512  }
   0x4   :  { %251 = vmatpush3.bf16.xpose.msk.msra.mxu0 %vm250_vm1, %v249_v3  ;;  %v253_v7 = vpack.c.bf16 %v22_v6, %v21_v5  ;;  %v18_v8 = vld [vmem:[%s353_s0] sm:$0xff]  ;;  %s291_s0 = smov [#allocation2]  }
   0x5   :  { %252 = vmatprep.subr.bf16.mxu0 %v288_v2  ;;  %v216_v9 = vld [vmem:[%s355_s2] ss:$0 sm:$0xff]  ;;  %s208_s28 = sshll.u32 %s291_s0, 4  ;;  %s209_s28 = int_to_ptr.vmem [resolvable:$true] %s208_s28 }
   0x6   :  { %v23_v17 = vld [vmem:[%s356_s3] sm:$0xff]  ;;  %s264_s2 = scalar_lea.vmem %s209_s28, 128  ;;  %p269_p1 = scmp.lt.s32.totalorder %s209_s28, %s209_s28 }
   0x7   :  { %p265_p0 = scmp.ne.s32.totalorder %s209_s28, %s264_s2  ;;  %p270_p2 = scmp.lt.s32.totalorder %s264_s2, %s264_s2 }
   0x9   :  { %p271_p3 = por %p270_p2, %p269_p1 }
   0xb   :  { %p272_p4 = pnand %p271_p3, %p265_p0 }
   0xc   :  { %255 = vmatpush3.bf16.xpose.msk.msra.mxu0 %vm250_vm1, %v253_v7 }
  0x13   :  { %241 = vmatmul.mubr.msk.f32.vlgmr.msra.gmra.mrb[0].mxu0 %vm31_vm0, %v18_v8 }
  0xe6   :  { %v113_v10 = vpop.f32.mrb[0].mxu0 }
  0xe7   :  { %v114_v11 = vadd.f32 %v216_v9, %v113_v10  ;;  %v242_v12 = vpop.f32.mrb[1].mxu0 }
  0xe9   :  { %v222_v13 = vmul.f32 -1.442695, %v114_v11 }
  0xeb   :  { %260 = vpow2.f32 %v222_v13 }
  0xf5   :  { %v261_v14 = vpop.eup %260 }
  0xf6   :  { %v120_v15 = vadd.f32 1.0, %v261_v14 }
  0xf8   :  { %262 = vrcp.f32 %v120_v15 }
 0x102   :  { %v263_v16 = vpop.eup %262 }
 0x103   :  { %244 = vmatpush3.xpose.msk.msra.mxu1 %vm123_vm3, %v263_v16 }
 0x106   :  { %246 = vmatmul.mubr.msk.f32.vlgmr.msra.gmra.mrb[0].mxu1 %vm123_vm3, %v23_v17 }
 0x1d9   :  { %v196_v18 = vpop.f32.mrb[0].mxu1 }
 0x1da   :  { %201 = vst.msk [vmem:[#allocation2] sm:$0xff] %vm200_vm4, %v196_v18  ;;  %v247_v19 = vpop.f32.mrb[1].mxu1 }
 0x1db   :  { %275 = shalt.err (!%p272_p4)
}
 0x1dc   :  { %s276_s5 = scalar_lea.hbm %s357_s4, 128 }
 0x1dd   :  { %p277_p5 = scmp.ne.s32.totalorder %s357_s4, %s276_s5  ;;  %p280_p6 = scmp.lt.u32.totalorder %s276_s5, %s357_s4 }
 0x1df   :  { %p282_p7 = pnand %p280_p6, %p277_p5 }
 0x1e1   :  { %285 = shalt.err (!%p282_p7)
}
 0x1e2   :  { %211 = dma.vmem_to_hbm [thread:$0]  %s209_s28, 128, %s357_s4, [#allocation3]  }
 0x1e3   :  { %286 = dma.done.wait [#allocation3], 128  }
 0x1e4   :  { %287 = vsyncadd [#allocation3], 4294967168 }
 0x1e5   :  { %215 = vsyncpa [#allocation3], 1 }

</bundles_post_ra>
